<compile_context>
chip_gen: v7x
topology: tpu7x:2x2x1
jax: 0.10.0
libtpu: 0.0.40
codegen_flags: <defaults>
</compile_context>

<pallas_src>
import jax
import jax.numpy as jnp
from jax import lax
from jax.experimental import pallas as pl
from jax.experimental.pallas import tpu as pltpu


def _bilinear_kernel(x_ref, o_ref):
    # x_ref block: (B, C, L); o_ref block: (B, C*C)  -- B samples per grid step.
    x = x_ref[...]                                                    # (B, C, L)

    # Batched Gram matrices: contract on L (axis 2), batch on axis 0 -> (B, C, C).
    # No explicit transpose: the MXU consumes the contraction directly; f32 accumulation.
    g = lax.dot_general(
        x, x,
        dimension_numbers=(((2,), (2,)), ((0,), (0,))),
        preferred_element_type=jnp.float32,
    )                                                                 # (B, C, C) f32

    # Lane-dense form BEFORE the elementwise/normalize chain: (B, C*C) fills 128 lanes per vreg
    # instead of only C of them.  The one relayout is paid here, once.
    b = g.shape[0]
    g = g.reshape(b, -1)                                              # (B, C*C)

    abs_g = jnp.abs(g)
    root = jnp.sqrt(abs_g)                                            # EUP slot
    # signed sqrt: one compare + select (cheaper than sign()'s compare/select/multiply chain).
    s = jnp.where(g < 0.0, -root, root)                               # (B, C*C)

    # Per-sample L2 normalization over the flattened C*C matrix.
    # Since s*s == |g| analytically, sum(|g|) is used: one XLU lane-reduce + one EUP rsqrt,
    # no extra C*C multiply.
    inv = lax.rsqrt(jnp.maximum(jnp.sum(abs_g, axis=1, keepdims=True), 1e-12))

    o_ref[...] = (s * inv).astype(o_ref.dtype)


def _per_step_vmem_bytes(b, C, L, in_itemsize):
    """Estimated VMEM bytes used by one grid step (double-buffered I/O + live intermediates)."""
    F = C * C
    io = 2 * b * C * L * in_itemsize + 2 * b * F * 4       # double-buffered input + output blocks
    live = b * C * L * 4 + 4 * b * F * 4                   # x (promoted) + g/abs_g/root/out
    return io + live


def _pick_block_b(N, C, L, in_itemsize, budget_bytes):
    """Largest batch block that (a) divides N, (b) is a multiple of 8 or == N (unmasked sublane
    stores), (c) fits the VMEM budget; prefer grid >= 2 when the half-size block is still large
    enough to amortize per-step overhead (megacore sharding on v7x)."""
    divisors = [d for d in range(1, N + 1) if N % d == 0]
    valid = [d for d in divisors if d % 8 == 0 or d == N] or divisors
    fitting = [d for d in valid if _per_step_vmem_bytes(d, C, L, in_itemsize) <= budget_bytes]
    if not fitting:
        return min(valid)
    best = max(fitting)
    if best == N:
        # Keep 2+ grid steps if a smaller block is still "big" (>= 2 MiB per step).
        alt = [d for d in fitting
               if d < N and _per_step_vmem_bytes(d, C, L, in_itemsize) >= (2 << 20)]
        if alt:
            best = max(alt)
    return best


def bilinear_module_forward(x, *, block_b=None, compute_dtype=None):
    """x: (N, C, L)  ->  (N, C, C) float32.

    compute_dtype=jnp.bfloat16 casts the input in the wrapper (halved HBM input bytes, full-rate
    bf16 MXU); accumulation and the sqrt/normalize path stay in float32.
    """
    N, C, L = x.shape
    F = C * C

    if compute_dtype is not None and x.dtype != compute_dtype:
        x = x.astype(compute_dtype)
    in_itemsize = jnp.dtype(x.dtype).itemsize

    # Generation-aware VMEM budget (v7x has 64 MiB physical VMEM, v5e/v6e have 128 MiB).
    try:
        vmem_cap = int(pltpu.get_tpu_info().vmem_capacity_bytes)
    except Exception:  # pragma: no cover - conservative fallback
        vmem_cap = 64 * 1024 * 1024
    budget = max(4 << 20, min(vmem_cap // 3, 48 << 20))

    if block_b is None:
        block_b = _pick_block_b(N, C, L, in_itemsize, budget)
    assert N % block_b == 0, "block_b must divide N"

    per_step = _per_step_vmem_bytes(block_b, C, L, in_itemsize)
    vmem_limit = int(min(vmem_cap * 3 // 4, max(32 << 20, per_step + (4 << 20))))

    cost = pl.CostEstimate(
        flops=2 * N * C * C * L + 6 * N * F,
        transcendentals=N * F + N,
        bytes_accessed=N * C * L * in_itemsize + N * F * 4,
    )

    out_flat = pl.pallas_call(
        _bilinear_kernel,
        out_shape=jax.ShapeDtypeStruct((N, F), jnp.float32),
        grid_spec=pltpu.PrefetchScalarGridSpec(
            num_scalar_prefetch=0,
            grid=(N // block_b,),
            in_specs=[pl.BlockSpec((block_b, C, L), lambda i: (i, 0, 0))],
            out_specs=pl.BlockSpec((block_b, F), lambda i: (i, 0)),
        ),
        compiler_params=pltpu.CompilerParams(
            dimension_semantics=("parallel",),
            vmem_limit_bytes=vmem_limit,
        ),
        cost_estimate=cost,
    )(x)
    return out_flat.reshape(N, C, C)


def _reference(x):
    g = jnp.einsum("ncl,nml->ncm", x, x)
    s = jnp.sign(g) * jnp.sqrt(jnp.abs(g))
    denom = jnp.sqrt(jnp.maximum(jnp.sum(s * s, axis=(1, 2), keepdims=True), 1e-12))
    return s / denom


if __name__ == "__main__":
    key = jax.random.PRNGKey(0)
    N, C, L = 8, 16, 64
    x = jax.random.normal(key, (N, C, L), dtype=jnp.float32)

    # Default f32 path (exact vs. the f32 reference).
    out = jax.block_until_ready(bilinear_module_forward(x))
    ref = _reference(x)
    assert out.shape == (N, C, C)
    assert jnp.allclose(out, ref, atol=1e-5, rtol=1e-5), "mismatch vs reference (f32 path)"

    # bf16 fast path (halved input HBM traffic, full-rate bf16 MXU); looser tolerance.
    out_bf16 = jax.block_until_ready(
        bilinear_module_forward(x, compute_dtype=jnp.bfloat16)
    )
    assert out_bf16.shape == (N, C, C)
    assert jnp.allclose(out_bf16, ref, atol=5e-2, rtol=5e-2), "mismatch vs reference (bf16 path)"

    print("KERNEL_OK")
</pallas_src>

<mosaic_0001>
module attributes {stable_mosaic.version = 11 : i64} {
  func.func @_bilinear_kernel(%arg0: i32, %arg1: memref<8x16x64xf32, #tpu.memory_space<vmem>>, %arg2: memref<8x256xf32, #tpu.memory_space<vmem>>) attributes {dimension_semantics = [#tpu.dimension_semantics<parallel>], iteration_bounds = array<i64: 1>, scalar_prefetch = 0 : i64, scratch_operands = 0 : i64, tpu.core_type = #tpu.core_type<tc>, window_params = [{transform_indices = @transform_0, window_bounds = array<i64: 8, 16, 64>}, {transform_indices = @transform_1, window_bounds = array<i64: 8, 256>}]} {
    %c0 = arith.constant 0 : index
    %c0_0 = arith.constant 0 : index
    %c0_1 = arith.constant 0 : index
    %0 = vector.load %arg1[%c0, %c0_0, %c0_1] : memref<8x16x64xf32, #tpu.memory_space<vmem>>, vector<8x16x64xf32>
    %cst = arith.constant dense<0.000000e+00> : vector<8x16x16xf32>
    %1 = tpu.matmul %0, %0, %cst {dimension_numbers = #tpu.dot_dimension_numbers<[2], [2], [1], [1], [0, 0, 0, 1, 1, 1], [0], [0]>} : vector<8x16x64xf32>, vector<8x16x64xf32>, vector<8x16x16xf32> -> vector<8x16x16xf32>
    %2 = vector.shape_cast %1 : vector<8x16x16xf32> to vector<8x256xf32>
    %3 = math.absf %2 : vector<8x256xf32>
    %4 = math.sqrt %3 : vector<8x256xf32>
    %cst_2 = arith.constant 0.000000e+00 : f32
    %5 = vector.broadcast %cst_2 : f32 to vector<8x256xf32>
    %6 = arith.cmpf olt, %2, %5 : vector<8x256xf32>
    %cst_3 = arith.constant 0.000000e+00 : f32
    %7 = vector.broadcast %cst_3 : f32 to vector<8x256xf32>
    %8 = arith.subf %7, %4 : vector<8x256xf32>
    %9 = arith.select %6, %8, %4 : vector<8x256xi1>, vector<8x256xf32>
    %cst_4 = arith.constant dense<0.000000e+00> : vector<8xf32>
    %10 = vector.multi_reduction <add>, %3, %cst_4 [1] : vector<8x256xf32> to vector<8xf32>
    %11 = vector.shape_cast %10 : vector<8xf32> to vector<8x1xf32>
    %cst_5 = arith.constant 9.99999996E-13 : f32
    %12 = vector.broadcast %cst_5 : f32 to vector<8x1xf32>
    %13 = arith.maximumf %11, %12 : vector<8x1xf32>
    %14 = math.rsqrt %13 : vector<8x1xf32>
    %15 = vector.broadcast %14 : vector<8x1xf32> to vector<8x256xf32>
    %16 = arith.mulf %9, %15 : vector<8x256xf32>
    %c0_6 = arith.constant 0 : index
    %c0_7 = arith.constant 0 : index
    %17 = vector.load %arg2[%c0_6, %c0_7] : memref<8x256xf32, #tpu.memory_space<vmem>>, vector<8x256xf32>
    tpu.vector_store %arg2[%c0_6, %c0_7], %16 {strides = array<i32>} : memref<8x256xf32, #tpu.memory_space<vmem>>, vector<8x256xf32>,
    return
  }
  func.func @transform_0(%arg0: i32) -> (i32, i32, i32) {
    %c0_i32 = arith.constant 0 : i32
    %c0_i32_0 = arith.constant 0 : i32
    %c0_i32_1 = arith.constant 0 : i32
    return %arg0, %c0_i32, %c0_i32_0 : i32, i32, i32
  }
  func.func @transform_1(%arg0: i32) -> (i32, i32) {
    %c0_i32 = arith.constant 0 : i32
    %c0_i32_0 = arith.constant 0 : i32
    return %arg0, %c0_i32 : i32, i32
  }
}

</mosaic_0001>

<bundles_post_ra>
// kernel: tpu_custom_call.1
= control target key start
LH: loop header
LB: loop body
LE: loop exit
PB: predicated region body
PF: predicated region fallthrough
CT: control target
= control target key end

     0   :  { %6 = vsyncpa [#allocation3], 0  ;;  %s1444_s0 = inlined_call_operand.hbm [shape: f32[8,16,64], index: 0, kind: input, shape index: {}]   ;;  %s1445_s1 = inlined_call_operand.hbm [shape: f32[8,256], index: 1, kind: output, shape index: {}]  }
   0x1   :  { %7 = vsyncpa [#allocation4], 0  ;;  %s1317_s6 = smov [#allocation2]   ;;  %s1269_s10 = scalar_lea.hbm %s1444_s0, 2048 }
   0x2   :  { %s13_s7 = sshll.u32 %s1317_s6, 4  ;;  %p1270_p0 = scmp.ne.s32.totalorder %s1444_s0, %s1269_s10  ;;  %s14_s7 = int_to_ptr.vmem [resolvable:$true] %s13_s7 }
   0x3   :  { %p1273_p1 = scmp.lt.u32.totalorder %s1269_s10, %s1444_s0 }
   0x5   :  { %p1275_p2 = pnand %p1273_p1, %p1270_p0 }
   0x7   :  { %1278 = shalt.err (!%p1275_p2)
}
   0x8   :  { %s1279_s15 = scalar_lea.vmem %s14_s7, 2048  ;;  %p1284_p4 = scmp.lt.s32.totalorder %s14_s7, %s14_s7 }
   0x9   :  { %p1280_p3 = scmp.ne.s32.totalorder %s14_s7, %s1279_s15  ;;  %p1285_p5 = scmp.lt.s32.totalorder %s1279_s15, %s1279_s15 }
   0xb   :  { %p1286_p6 = por %p1285_p5, %p1284_p4 }
   0xd   :  { %p1287_p7 = pnand %p1286_p6, %p1280_p3 }
   0xf   :  { %1290 = shalt.err (!%p1287_p7)
}
  0x10   :  { %s1318_s16 = smov 128   ;;  %s1319_s17 = smov 8  }
  0x11   :  { %19 = dma.hbm_to_vmem [thread:$0]  %s1444_s0, 2048, %s14_s7, [#allocation3], %s1318_s16, %s1318_s16, %s1319_s17  }
  0x12   :  { %1313 = dma.done.wait [#allocation3], 2048  }
  0x13   :  { %1314 = vsyncadd [#allocation3], 4294965248  ;;  %vm39_vm0 = vcmask 523264   ;;  %v23_v1 = vld [vmem:[#allocation2] sm:$0xff]  ;;  %v24_v2 = vld [vmem:[#allocation2 + $0x8] sm:$0xff]  ;;  %v693_v27 = vlaneseq  ;;  %s1322_s0 = smov 32  }
  0x14   :  { %vm1354_vm1 = vmpackc.low %vm39_vm0, %vm39_vm0  ;;  %v25_v3 = vld [vmem:[#allocation2 + $0x10] sm:$0xff]  ;;  %v1202_v4 = vpack.c.bf16 %v24_v2, %v23_v1  ;;  %v26_v5 = vld [vmem:[#allocation2 + $0x18] sm:$0xff]  ;;  %1150 = vmatprep.mubr.msk.f32.mxu0 %vm39_vm0, %v23_v1  ;;  %v1320_v25 = vmov 1983009808   ;;  %v1321_v40 = vmov 1934713408  }
  0x15   :  { %1157 = vmatprep.mubr.msk.f32.mxu1 %vm39_vm0, %v25_v3  ;;  %v27_v6 = vld [vmem:[#allocation2 + $0x20] sm:$0xff]  ;;  %v28_v7 = vld [vmem:[#allocation2 + $0x28] sm:$0xff]  ;;  %v1208_v8 = vpack.c.bf16 %v26_v5, %v25_v3  ;;  %v29_v10 = vld [vmem:[#allocation2 + $0x30] sm:$0xff]  ;;  %v691_v26 = vunpack.c.l.s4 %v1320_v25  ;;  %v694_v33 = vshrl.u32 %v693_v27, 7  ;;  %v755_v41 = vunpack.c.l.s4 %v1321_v40  ;;  %s1323_s20 = smov 16   ;;  %s1324_s21 = smov 48  }
  0x16   :  { %v1214_v9 = vpack.c.bf16 %v28_v7, %v27_v6  ;;  %v30_v11 = vld [vmem:[#allocation2 + $0x38] sm:$0xff]  ;;  %1204 = vmatprep.subr.msk.bf16.mxu0 %vm1354_vm1, %v1202_v4  ;;  %v31_v13 = vld [vmem:[#allocation2 + $0x40] sm:$0xff]  ;;  %v32_v14 = vld [vmem:[#allocation2 + $0x48] sm:$0xff]  ;;  %s1325_s22 = smov 64   ;;  %s1326_s23 = smov 80   ;;  %vm1016_vm2 = vcmask 130048  }
  0x17   :  { %v1220_v12 = vpack.c.bf16 %v30_v11, %v29_v10  ;;  %1210 = vmatprep.subr.msk.bf16.mxu1 %vm1354_vm1, %v1208_v8  ;;  %1207 = vmatpush3.bf16.xpose.msk.msra.mxu0 %vm1354_vm1, %v1202_v4  ;;  %v33_v15 = vld [vmem:[#allocation2 + $0x50] sm:$0xff]  ;;  %v34_v16 = vld [vmem:[#allocation2 + $0x58] sm:$0xff]  ;;  %v1226_v17 = vpack.c.bf16 %v32_v14, %v31_v13  ;;  %v35_v19 = vld [vmem:[#allocation2 + $0x60] sm:$0xff]  ;;  %v692_v32 = vunpack.c.0.s8 %v691_v26  ;;  %s1327_s24 = smov 96   ;;  %s1328_s25 = smov 112   ;;  %vm1018_vm3 = vcmask 261120  }
  0x18   :  { %1213 = vmatpush3.bf16.xpose.msk.msra.mxu1 %vm1354_vm1, %v1208_v8  ;;  %1216 = vmatprep.subr.msk.bf16.mxu0 %vm1354_vm1, %v1214_v9  ;;  %v1232_v18 = vpack.c.bf16 %v34_v16, %v33_v15  ;;  %v36_v20 = vld [vmem:[#allocation2 + $0x68] sm:$0xff]  ;;  %v37_v21 = vld [vmem:[#allocation2 + $0x70] sm:$0xff]  ;;  %v38_v22 = vld [vmem:[#allocation2 + $0x78] sm:$0xff]  ;;  %vm1020_vm4 = vcmask 392192   ;;  %vm1023_vm5 = vcmask 654336   ;;  %vm1025_vm6 = vcmask 785408  }
  0x19   :  { %1222 = vmatprep.subr.msk.bf16.mxu1 %vm1354_vm1, %v1220_v12  ;;  %v1238_v23 = vpack.c.bf16 %v36_v20, %v35_v19  ;;  %v1244_v24 = vpack.c.bf16 %v38_v22, %v37_v21  ;;  %v695_v34 = vsub.s32 %v692_v32, %v694_v33  ;;  %vm1027_vm7 = vcmask 916480   ;;  %s1329_s26 = smov [#allocation5]  }
  0x1a   :  { %s1073_s27 = sshll.u32 %s1329_s26, 4  ;;  %s1074_s27 = int_to_ptr.vmem [resolvable:$true] %s1073_s27 }
  0x1b   :  { %s1291_s28 = scalar_lea.vmem %s1074_s27, 256  ;;  %p1296_p9 = scmp.lt.s32.totalorder %s1074_s27, %s1074_s27 }
  0x1c   :  { %p1292_p8 = scmp.ne.s32.totalorder %s1074_s27, %s1291_s28  ;;  %p1297_p10 = scmp.lt.s32.totalorder %s1291_s28, %s1291_s28 }
  0x1e   :  { %1151 = vmatmul.mubr.msk.f32.vlgmr.msra.gmra.mrb[0].mxu0 %vm39_vm0, %v24_v2  ;;  %v756_v2 = vunpack.c.0.s8 %v755_v41  ;;  %p1298_p11 = por %p1297_p10, %p1296_p9 }
  0x1f   :  { %1158 = vmatmul.mubr.msk.f32.vlgmr.msra.gmra.mrb[0].mxu1 %vm39_vm0, %v26_v5  ;;  %1219 = vmatpush3.bf16.xpose.msk.msra.mxu0 %vm1354_vm1, %v1214_v9 }
  0x20   :  { %1225 = vmatpush3.bf16.xpose.msk.msra.mxu1 %vm1354_vm1, %v1220_v12  ;;  %1164 = vmatprep.mubr.msk.f32.mxu0 %vm39_vm0, %v27_v6  ;;  %v759_v6 = vsub.s32 %v756_v2, %v694_v33  ;;  %p1299_p12 = pnand %p1298_p11, %p1292_p8 }
  0x21   :  { %1171 = vmatprep.mubr.msk.f32.mxu1 %vm39_vm0, %v29_v10  ;;  %1228 = vmatprep.subr.msk.bf16.mxu0 %vm1354_vm1, %v1226_v17 }
  0x22   :  { %1234 = vmatprep.subr.msk.bf16.mxu1 %vm1354_vm1, %v1232_v18 }
  0x26   :  { %1165 = vmatmul.mubr.msk.f32.vlgmr.msra.gmra.mrb[2].mxu0 %vm39_vm0, %v28_v7 }
  0x27   :  { %1172 = vmatmul.mubr.msk.f32.vlgmr.msra.gmra.mrb[2].mxu1 %vm39_vm0, %v30_v11  ;;  %1231 = vmatpush3.bf16.xpose.msk.msra.mxu0 %vm1354_vm1, %v1226_v17 }
  0x28   :  { %1237 = vmatpush3.bf16.xpose.msk.msra.mxu1 %vm1354_vm1, %v1232_v18  ;;  %1178 = vmatprep.mubr.msk.f32.mxu0 %vm39_vm0, %v31_v13 }
  0x29   :  { %1185 = vmatprep.mubr.msk.f32.mxu1 %vm39_vm0, %v33_v15  ;;  %1240 = vmatprep.subr.msk.bf16.mxu0 %vm1354_vm1, %v1238_v23 }
  0x2a   :  { %1246 = vmatprep.subr.msk.bf16.mxu1 %vm1354_vm1, %v1244_v24 }
  0x2e   :  { %1179 = vmatmul.mubr.msk.f32.vlgmr.msra.gmra.mrb[4].mxu0 %vm39_vm0, %v32_v14 }
  0x2f   :  { %1186 = vmatmul.mubr.msk.f32.vlgmr.msra.gmra.mrb[4].mxu1 %vm39_vm0, %v34_v16  ;;  %1243 = vmatpush3.bf16.xpose.msk.msra.mxu0 %vm1354_vm1, %v1238_v23 }
  0x30   :  { %1249 = vmatpush3.bf16.xpose.msk.msra.mxu1 %vm1354_vm1, %v1244_v24  ;;  %1192 = vmatprep.mubr.msk.f32.mxu0 %vm39_vm0, %v35_v19 }
  0x31   :  { %1199 = vmatprep.mubr.msk.f32.mxu1 %vm39_vm0, %v37_v21 }
  0x36   :  { %1193 = vmatmul.mubr.msk.f32.vlgmr.msra.gmra.mrb[6].mxu0 %vm39_vm0, %v36_v20 }
  0x37   :  { %1200 = vmatmul.mubr.msk.f32.vlgmr.msra.gmra.mrb[6].mxu1 %vm39_vm0, %v38_v22 }
  0xf1   :  { %v1152_v28 = vpop.f32.mrb[0].mxu0 }
  0xf2   :  { %v1159_v29 = vpop.f32.mrb[0].mxu1  ;;  %v112_v30 = vpop.f32.mrb[1].mxu0 }
  0xf3   :  { %v193_v31 = vpop.f32.mrb[1].mxu1 }
  0xf9   :  { %v1166_v35 = vpop.f32.mrb[2].mxu0 }
  0xfa   :  { %v824_v36 = vcombine.low %v1152_v28, %v1166_v35  ;;  %v825_v37 = vcombine.high %v1152_v28, %v1166_v35  ;;  %v1173_v38 = vpop.f32.mrb[2].mxu1  ;;  %v274_v39 = vpop.f32.mrb[3].mxu0 }
  0xfb   :  { %v840_v42 = vcombine.low %v1159_v29, %v1173_v38  ;;  %v841_v43 = vcombine.high %v1159_v29, %v1173_v38  ;;  %v688_v44 = vcombine.low %v112_v30, %v274_v39  ;;  %v689_v45 = vcombine.high %v112_v30, %v274_v39  ;;  %v355_v46 = vpop.f32.mrb[3].mxu1 }
  0xfc   :  { %v832_v47 = vrot.slane %v824_v36, %v695_v34  ;;  %v839_v48 = vrot.slane %v825_v37, %v695_v34  ;;  %v704_v49 = vcombine.low %v193_v31, %v355_v46  ;;  %v705_v50 = vcombine.high %v193_v31, %v355_v46 }
  0xfd   :  { %v848_v51 = vrot.slane %v840_v42, %v695_v34  ;;  %v855_v52 = vrot.slane %v841_v43, %v695_v34  ;;  %v696_v53 = vrot.slane %v688_v44, %v695_v34  ;;  %v703_v54 = vrot.slane %v689_v45, %v695_v34 }
  0xfe   :  { %v712_v55 = vrot.slane %v704_v49, %v695_v34  ;;  %v719_v56 = vrot.slane %v705_v50, %v695_v34 }
  0xff   :  { %v904_v57 = vcombine.low %v839_v48, %v855_v52  ;;  %v905_v58 = vcombine.high %v839_v48, %v855_v52  ;;  %v889_v59 = vcombine.high %v832_v47, %v848_v51  ;;  %v888_v60 = vcombine.low %v832_v47, %v848_v51 }
 0x100   :  { %v752_v61 = vcombine.low %v696_v53, %v712_v55  ;;  %v753_v62 = vcombine.high %v696_v53, %v712_v55  ;;  %v768_v63 = vcombine.low %v703_v54, %v719_v56  ;;  %v769_v0 = vcombine.high %v703_v54, %v719_v56 }
 0x101   :  { %v1180_v1 = vpop.f32.mrb[4].mxu0  ;;  %v1406_v8 = vrot.slane %v889_v59, %v759_v6  ;;  %v1408_v9 = vrot.slane %v888_v60, %v759_v6  ;;  %v1410_v10 = vrot.slane %v904_v57, %v759_v6  ;;  %v1412_v11 = vrot.slane %v905_v58, %v759_v6 }
 0x102   :  { %v1187_v3 = vpop.f32.mrb[4].mxu1  ;;  %v436_v4 = vpop.f32.mrb[5].mxu0  ;;  %v1414_v16 = vrot.slane %v752_v61, %v759_v6  ;;  %v1416_v17 = vrot.slane %v753_v62, %v759_v6  ;;  %v776_v33 = vrot.slane %v768_v63, %v759_v6  ;;  %v783_v35 = vrot.slane %v769_v0, %v759_v6 }
 0x103   :  { %v517_v5 = vpop.f32.mrb[5].mxu1 }
 0x109   :  { %v1194_v7 = vpop.f32.mrb[6].mxu0 }
 0x10a   :  { %v856_v12 = vcombine.low %v1180_v1, %v1194_v7  ;;  %v857_v13 = vcombine.high %v1180_v1, %v1194_v7  ;;  %v1201_v14 = vpop.f32.mrb[6].mxu1  ;;  %v598_v15 = vpop.f32.mrb[7].mxu0 }
 0x10b   :  { %v872_v18 = vcombine.low %v1187_v3, %v1201_v14  ;;  %v873_v19 = vcombine.high %v1187_v3, %v1201_v14  ;;  %v720_v20 = vcombine.low %v436_v4, %v598_v15  ;;  %v721_v21 = vcombine.high %v436_v4, %v598_v15  ;;  %v679_v22 = vpop.f32.mrb[7].mxu1 }
 0x10c   :  { %v864_v23 = vrot.slane %v856_v12, %v695_v34  ;;  %v871_v24 = vrot.slane %v857_v13, %v695_v34  ;;  %v736_v25 = vcombine.low %v517_v5, %v679_v22  ;;  %v737_v26 = vcombine.high %v517_v5, %v679_v22 }
 0x10d   :  { %v880_v27 = vrot.slane %v872_v18, %v695_v34  ;;  %v887_v28 = vrot.slane %v873_v19, %v695_v34  ;;  %v728_v29 = vrot.slane %v720_v20, %v695_v34  ;;  %v735_v30 = vrot.slane %v721_v21, %v695_v34 }
 0x10e   :  { %v744_v31 = vrot.slane %v736_v25, %v695_v34  ;;  %v751_v32 = vrot.slane %v737_v26, %v695_v34 }
 0x10f   :  { %v936_v36 = vcombine.low %v871_v24, %v887_v28  ;;  %v937_v37 = vcombine.high %v871_v24, %v887_v28  ;;  %v921_v38 = vcombine.high %v864_v23, %v880_v27  ;;  %v920_v39 = vcombine.low %v864_v23, %v880_v27 }
 0x110   :  { %v784_v40 = vcombine.low %v728_v29, %v744_v31  ;;  %v785_v41 = vcombine.high %v728_v29, %v744_v31  ;;  %v800_v42 = vcombine.low %v735_v30, %v751_v32  ;;  %v801_v43 = vcombine.high %v735_v30, %v751_v32 }
 0x111   :  { %v935_v44 = vrot.slane %v921_v38, %v759_v6  ;;  %v928_v45 = vrot.slane %v920_v39, %v759_v6  ;;  %v944_v46 = vrot.slane %v936_v36, %v759_v6  ;;  %v951_v47 = vrot.slane %v937_v37, %v759_v6 }
 0x112   :  { %v792_v48 = vrot.slane %v784_v40, %v759_v6  ;;  %v799_v49 = vrot.slane %v785_v41, %v759_v6  ;;  %v808_v50 = vrot.slane %v800_v42, %v759_v6  ;;  %v815_v51 = vrot.slane %v801_v43, %v759_v6 }
 0x113   :  { %v954_v34 = vcombine.low %v1406_v8, %v935_v44  ;;  %v953_v52 = vcombine.high %v1408_v9, %v928_v45  ;;  %v952_v53 = vcombine.low %v1408_v9, %v928_v45  ;;  %v955_v54 = vcombine.high %v1406_v8, %v935_v44 }
 0x114   :  { %v817_v55 = vcombine.high %v1414_v16, %v792_v48  ;;  %v956_v56 = vcombine.low %v1410_v10, %v944_v46  ;;  %v819_v57 = vcombine.high %v1416_v17, %v799_v49  ;;  %v957_v58 = vcombine.high %v1410_v10, %v944_v46 }
 0x115   :  { %993 = vrot.lane.b32.xlu1 %v954_v34, %s1322_s0  ;;  %989 = vrot.lane.b32.xlu0 %v953_v52, %s1323_s20  ;;  %v820_v59 = vcombine.low %v776_v33, %v808_v50  ;;  %v818_v60 = vcombine.low %v1416_v17, %v799_v49  ;;  %v821_v61 = vcombine.high %v776_v33, %v808_v50 }
 0x116   :  { %v958_v62 = vcombine.low %v1412_v11, %v951_v47  ;;  %v822_v63 = vcombine.low %v783_v35, %v815_v51  ;;  %v959_v0 = vcombine.high %v1412_v11, %v951_v47  ;;  %v823_v1 = vcombine.high %v783_v35, %v815_v51 }
 0x117   :  { %v816_v2 = vcombine.low %v1414_v16, %v792_v48 }
 0x119   :  { %997 = vrot.lane.b32.xlu1 %v955_v54, %s1324_s21  ;;  %961 = vrot.lane.b32.xlu0 %v817_v55, %s1323_s20 }
 0x11d   :  { %1001 = vrot.lane.b32.xlu1 %v956_v56, %s1325_s22  ;;  %969 = vrot.lane.b32.xlu0 %v819_v57, %s1324_s21 }
 0x121   :  { %1005 = vrot.lane.b32.xlu1 %v957_v58, %s1326_s23  ;;  %973 = vrot.lane.b32.xlu0 %v820_v59, %s1325_s22 }
 0x125   :  { %965 = vrot.lane.b32.xlu1 %v818_v60, %s1322_s0  ;;  %977 = vrot.lane.b32.xlu0 %v821_v61, %s1326_s23 }
 0x129   :  { %1009 = vrot.lane.b32.xlu1 %v958_v62, %s1327_s24  ;;  %981 = vrot.lane.b32.xlu0 %v822_v63, %s1327_s24 }
 0x12d   :  { %1013 = vrot.lane.b32.xlu1 %v959_v0, %s1328_s25  ;;  %985 = vrot.lane.b32.xlu0 %v823_v1, %s1328_s25 }
 0x187   :  { %v994_v3 = vpop.permute.xlu1 %993  ;;  %v990_v4 = vpop.permute.xlu0 %989 }
 0x188   :  { %v1029_v14 = vsel %vm1016_vm2, %v952_v53, %v990_v4 }
 0x189   :  { %v1030_v18 = vsel %vm1018_vm3, %v1029_v14, %v994_v3 }
 0x18b   :  { %v998_v5 = vpop.permute.xlu1 %997  ;;  %v962_v6 = vpop.permute.xlu0 %961 }
 0x18c   :  { %v1017_v11 = vsel %vm1016_vm2, %v816_v2, %v962_v6  ;;  %v1031_v21 = vsel %vm1020_vm4, %v1030_v18, %v998_v5 }
 0x18f   :  { %v1002_v7 = vpop.permute.xlu1 %1001  ;;  %v970_v8 = vpop.permute.xlu0 %969 }
 0x190   :  { %v1032_v23 = vsel %vm39_vm0, %v1031_v21, %v1002_v7 }
 0x193   :  { %v1006_v9 = vpop.permute.xlu1 %1005  ;;  %v974_v10 = vpop.permute.xlu0 %973 }
 0x194   :  { %v1033_v24 = vsel %vm1023_vm5, %v1032_v23, %v1006_v9 }
 0x197   :  { %v966_v12 = vpop.permute.xlu1 %965  ;;  %v978_v13 = vpop.permute.xlu0 %977 }
 0x198   :  { %v1019_v15 = vsel %vm1018_vm3, %v1017_v11, %v966_v12 }
 0x199   :  { %v1021_v16 = vsel %vm1020_vm4, %v1019_v15, %v970_v8 }
 0x19a   :  { %v1022_v17 = vsel %vm39_vm0, %v1021_v16, %v974_v10 }
 0x19b   :  { %v1010_v19 = vpop.permute.xlu1 %1009  ;;  %v982_v20 = vpop.permute.xlu0 %981  ;;  %v1024_v22 = vsel %vm1023_vm5, %v1022_v17, %v978_v13 }
 0x19c   :  { %v1034_v25 = vsel %vm1025_vm6, %v1033_v24, %v1010_v19  ;;  %v1026_v26 = vsel %vm1025_vm6, %v1024_v22, %v982_v20 }
 0x19f   :  { %v1014_v27 = vpop.permute.xlu1 %1013  ;;  %v986_v28 = vpop.permute.xlu0 %985 }
 0x1a0   :  { %v1035_v29 = vsel %vm1027_vm7, %v1034_v25, %v1014_v27  ;;  %v1028_v30 = vsel %vm1027_vm7, %v1026_v26, %v986_v28 }
 0x1a1   :  { %v1037_v31 = vand.u32 2147483647, %v1035_v29  ;;  %v1036_v32 = vand.u32 2147483647, %v1028_v30  ;;  %vm1053_vm12 = vcmp.lt.f32.partialorder %v1035_v29, 0.0  ;;  %vm1052_vm13 = vcmp.lt.f32.partialorder %v1028_v30, 0.0 }
 0x1a3   :  { %1263 = vrsqrt.f32 %v1037_v31  ;;  %v1058_v33 = vadd.f32 %v1037_v31, %v1036_v32  ;;  %vm1047_vm8 = vcmp.eq.f32.partialorder %v1037_v31, inf  ;;  %v1050_v38 = vand.u32 2147483648, %v1037_v31 }
 0x1a4   :  { %1265 = vrsqrt.f32 %v1036_v32  ;;  %vm1049_vm9 = vcmp.eq.f32.partialorder %v1037_v31, 0.0  ;;  %vm1040_vm10 = vcmp.eq.f32.partialorder %v1036_v32, inf  ;;  %v1043_v41 = vand.u32 2147483648, %v1036_v32 }
 0x1a5   :  { %1059 = vadd.xlane.f32.xlu0 %v1058_v33  ;;  %vm1042_vm11 = vcmp.eq.f32.partialorder %v1036_v32, 0.0 }
 0x1ad   :  { %v1264_v35 = vpop.eup %1263 }
 0x1ae   :  { %v1266_v36 = vpop.eup %1265  ;;  %v1046_v37 = vmul.f32 %v1264_v35, %v1037_v31 }
 0x1af   :  { %v1039_v39 = vmul.f32 %v1266_v36, %v1036_v32 }
 0x1b0   :  { %v1048_v40 = vsel %vm1047_vm8, %v1037_v31, %v1046_v37 }
 0x1b1   :  { %v1051_v42 = vsel %vm1049_vm9, %v1050_v38, %v1048_v40  ;;  %v1041_v43 = vsel %vm1040_vm10, %v1036_v32, %v1039_v39 }
 0x1b2   :  { %v1055_v44 = vsub.f32 0.0, %v1051_v42  ;;  %v1044_v45 = vsel %vm1042_vm11, %v1043_v41, %v1041_v43 }
 0x1b3   :  { %v1054_v46 = vsub.f32 0.0, %v1044_v45 }
 0x1b4   :  { %v1057_v47 = vsel %vm1053_vm12, %v1055_v44, %v1051_v42 }
 0x1b5   :  { %v1056_v48 = vsel %vm1052_vm13, %v1054_v46, %v1044_v45 }
 0x232   :  { %v1060_v49 = vpop.xlane.xlu0 %1059 }
 0x233   :  { %v1061_v50 = vmax.f32 %v1060_v49, 1e-12 }
 0x235   :  { %1267 = vrsqrt.f32 %v1061_v50 }
 0x23f   :  { %v1268_v51 = vpop.eup %1267 }
 0x240   :  { %v1063_v34 = vmul.f32 %v1268_v51, %v1056_v48  ;;  %v1064_v52 = vmul.f32 %v1268_v51, %v1057_v47 }
 0x242   :  { %1065 = vst [vmem:[#allocation5] sm:$0xff] %v1063_v34  ;;  %1066 = vst [vmem:[#allocation5 + $0x8] sm:$0xff] %v1064_v52 }
 0x243   :  { %1302 = shalt.err (!%p1299_p12)
}
 0x244   :  { %s1303_s2 = scalar_lea.hbm %s1445_s1, 256 }
 0x245   :  { %p1304_p13 = scmp.ne.s32.totalorder %s1445_s1, %s1303_s2  ;;  %p1307_p0 = scmp.lt.u32.totalorder %s1303_s2, %s1445_s1 }
 0x247   :  { %p1309_p1 = pnand %p1307_p0, %p1304_p13 }
 0x249   :  { %1312 = shalt.err (!%p1309_p1)
}
 0x24a   :  { %1076 = dma.vmem_to_hbm [thread:$0]  %s1074_s27, 256, %s1445_s1, [#allocation4]  }
 0x24b   :  { %1315 = dma.done.wait [#allocation4], 256  }
 0x24c   :  { %1316 = vsyncadd [#allocation4], 4294967040 }
 0x24d   :  { %1080 = vsyncpa [#allocation3], 1 }
 0x24e   :  { %1081 = vsyncpa [#allocation4], 1 }

</bundles_post_ra>
